<compile_context>
chip_gen: v6e
topology: v6e:2x2x1
jax: 0.10.0
libtpu: 0.0.40
codegen_flags: <defaults>
</compile_context>

<pallas_src>
import functools

import numpy as np
import jax
import jax.numpy as jnp
from jax import lax
from jax.experimental import pallas as pl
from jax.experimental.pallas import tpu as pltpu


# ----------------------------------------------------------------------------
# helpers
# ----------------------------------------------------------------------------
def _choose_tn(n, target):
    """Largest divisor of n <= target, keeping >=2 grid steps when n>=2 (v7x has 2 TCs)."""
    cap = max(1, min(target, n // 2 if n >= 2 else n))
    for t in range(cap, 0, -1):
        if n % t == 0:
            return t
    return 1


def _mosaic_params(vmem_need_bytes):
    """Explicit scoped-VMEM request: ~2x need (double buffering) + headroom, v7x-safe cap."""
    limit = int(min(max(2 * int(vmem_need_bytes) + (2 << 20), 8 << 20), 64 << 20))
    return pltpu.CompilerParams(dimension_semantics=("parallel",),
                                vmem_limit_bytes=limit)


def _bn_affine(st, gamma, beta, count, eps):
    """Training-mode BatchNorm1d affine from packed per-group partial (sum, sumsq)."""
    s = jnp.sum(st[:, :, 0], axis=0)
    q = jnp.sum(st[:, :, 1], axis=0)
    mean = s / count
    # TODO(synk): E[x^2]-E[x]^2 can cancel for large activations; a centered second pass
    # would be more robust (kept single-pass to preserve the fusion structure).
    var = jnp.maximum(q / count - mean * mean, 0.0)
    scale = gamma.astype(jnp.float32) * lax.rsqrt(var + eps)
    shift = beta.astype(jnp.float32) - mean * scale
    return scale.reshape(-1, 1), shift.reshape(-1, 1)


# ----------------------------------------------------------------------------
# Kernel 1: ConvTranspose1d + F.interpolate(mode='linear')  (+ BN1 partial stats)
# ----------------------------------------------------------------------------
def unpool_interp_kernel(x_ref, t_ref, w_ref, b_ref, m_ref, y_ref, st_ref, slab_ref,
                         *, tn, c_in, lp, kt):
    """One group of TN samples.

    x_ref:  (TN*C_in, L_in)   rows ordered sample-major (row = t*C_in + ci)
    t_ref:  (L_in, KT*Lp)     combined per-tap ConvT+interp length operators (zero halos)
    w_ref:  (C_out, KT*C_in)  bf16 flattened ConvT weights  [co, j*C_in + ci]
    b_ref:  (C_out, 1)        ConvT bias (interp weights sum to 1 per column)
    m_ref:  (1, TN*Lp)        lane mask: 1 at data columns, 0 at per-sample halo columns
    y_ref:  (C_out, TN*Lp)    bf16 output in canonical segment layout (halos zeroed)
    st_ref: (C_out, 2)        f32 per-group (sum, sumsq) for BN1 batch stats
    slab_ref: VMEM (KT*C_in, TN*Lp) f32 scratch feeding one big MXU contraction
    """
    # one matmul for all taps & all samples of the group
    stack = jnp.dot(x_ref[...], t_ref[...], preferred_element_type=jnp.float32)
    # re-arrange (t, ci) x (j, e)  ->  (j, ci) x (t, e)   (static slices only)
    for j in range(kt):
        for t in range(tn):
            slab_ref[pl.ds(j * c_in, c_in), pl.ds(t * lp, lp)] = (
                stack[t * c_in:(t + 1) * c_in, j * lp:(j + 1) * lp])
    y = jnp.dot(w_ref[...], slab_ref[...].astype(jnp.bfloat16),
                preferred_element_type=jnp.float32) + b_ref[...]
    ym = y * m_ref[...]                       # zero halo columns
    y_ref[...] = ym.astype(jnp.bfloat16)
    st_ref[:, pl.ds(0, 1)] = jnp.sum(ym, axis=-1, keepdims=True)
    st_ref[:, pl.ds(1, 1)] = jnp.sum(ym * ym, axis=-1, keepdims=True)


def unpool_interp_pallas(x_g, tcat, w_up, b_up, mask, *, tn, c_in, c_out, lp, kt):
    g_dim, rows, l_in = x_g.shape
    w = tn * lp
    need = ((rows * l_in + l_in * kt * lp + w + c_out + kt * c_in * w) * 4
            + (c_out * kt * c_in + c_out * w) * 2 + c_out * 2 * 4)
    kern = functools.partial(unpool_interp_kernel, tn=tn, c_in=c_in, lp=lp, kt=kt)
    return pl.pallas_call(
        kern,
        grid=(g_dim,),
        in_specs=[
            pl.BlockSpec((None, rows, l_in), lambda g: (g, 0, 0)),
            pl.BlockSpec((l_in, kt * lp), lambda g: (0, 0)),
            pl.BlockSpec((c_out, kt * c_in), lambda g: (0, 0)),
            pl.BlockSpec((c_out, 1), lambda g: (0, 0)),
            pl.BlockSpec((1, w), lambda g: (0, 0)),
        ],
        out_specs=[
            pl.BlockSpec((None, c_out, w), lambda g: (g, 0, 0)),
            pl.BlockSpec((None, c_out, 2), lambda g: (g, 0, 0)),
        ],
        out_shape=[
            jax.ShapeDtypeStruct((g_dim, c_out, w), jnp.bfloat16),
            jax.ShapeDtypeStruct((g_dim, c_out, 2), jnp.float32),
        ],
        scratch_shapes=[pltpu.VMEM((kt * c_in, w), jnp.float32)],
        compiler_params=_mosaic_params(need),
    )(x_g, tcat, w_up, b_up, mask)


# ----------------------------------------------------------------------------
# Kernel 2: BN1+ReLU -> conv1(2C->C over the VMEM-resident concat) -> ReLU
#           -> conv2(C->C)  (+ BN2 partial stats).  Skip concat never touches HBM.
# ----------------------------------------------------------------------------
def fused_block_kernel(y_ref, e_ref, m_ref, sc1_ref, sh1_ref, w1_ref, b1_ref,
                       w2_ref, b2_ref, h_ref, st_ref,
                       stg1_ref, slab1_ref, stg2_ref, slab2_ref, *, k, pad, w):
    """y_ref/e_ref: (C, W) bf16 canonical segment layout; W = TN*(L_enc+2*pad).
    stg1: (2C, W+2*pad) holds [ya; enc] stacked on sublanes (independent of stg2 -> no WAR).
    Only the 2*pad side columns of each staging buffer are zeroed.
    """
    c = sc1_ref.shape[0]
    m = m_ref[...]

    # BN1 (precomputed batch-stat affine) + ReLU, per-sample halo columns re-zeroed.
    ya = jnp.maximum(y_ref[...].astype(jnp.float32) * sc1_ref[...] + sh1_ref[...], 0.0) * m

    # conv1 over cat([ya, enc], channel dim) with 'same' padding.
    z2 = jnp.zeros((2 * c, pad), jnp.float32)
    stg1_ref[:, pl.ds(0, pad)] = z2
    stg1_ref[:, pl.ds(pad + w, pad)] = z2
    stg1_ref[pl.ds(0, c), pl.ds(pad, w)] = ya
    stg1_ref[pl.ds(c, c), pl.ds(pad, w)] = e_ref[...].astype(jnp.float32)
    for j in range(k):                                    # K shifted (2C, W) copies
        slab1_ref[pl.ds(j * 2 * c, 2 * c), :] = stg1_ref[:, pl.ds(j, w)]
    h1 = jnp.dot(w1_ref[...], slab1_ref[...].astype(jnp.bfloat16),
                 preferred_element_type=jnp.float32) + b1_ref[...]
    h1 = jnp.maximum(h1, 0.0) * m
    # TODO(synk): dropout inside MultiConv1D treated as identity (p=0 / eval semantics).

    # conv2 (C -> C), 'same' padding.
    z1 = jnp.zeros((c, pad), jnp.float32)
    stg2_ref[:, pl.ds(0, pad)] = z1
    stg2_ref[:, pl.ds(pad + w, pad)] = z1
    stg2_ref[:, pl.ds(pad, w)] = h1
    for j in range(k):
        slab2_ref[pl.ds(j * c, c), :] = stg2_ref[:, pl.ds(j, w)]
    h2 = jnp.dot(w2_ref[...], slab2_ref[...].astype(jnp.bfloat16),
                 preferred_element_type=jnp.float32) + b2_ref[...]
    h2 = h2 * m

    h_ref[...] = h2.astype(jnp.bfloat16)
    st_ref[:, pl.ds(0, 1)] = jnp.sum(h2, axis=-1, keepdims=True)
    st_ref[:, pl.ds(1, 1)] = jnp.sum(h2 * h2, axis=-1, keepdims=True)


def fused_block_pallas(y_g, enc_g, mask, sc1, sh1, w1, b1, w2, b2, *, k, pad):
    g_dim, c, w = y_g.shape
    need = (3 * c * w * 2 + (w + 4 * c) * 4 + (3 * k * c * c) * 2
            + (3 * c * (w + 2 * pad) + 3 * k * c * w) * 4)
    kern = functools.partial(fused_block_kernel, k=k, pad=pad, w=w)
    return pl.pallas_call(
        kern,
        grid=(g_dim,),
        in_specs=[
            pl.BlockSpec((None, c, w), lambda g: (g, 0, 0)),
            pl.BlockSpec((None, c, w), lambda g: (g, 0, 0)),
            pl.BlockSpec((1, w), lambda g: (0, 0)),
            pl.BlockSpec((c, 1), lambda g: (0, 0)),
            pl.BlockSpec((c, 1), lambda g: (0, 0)),
            pl.BlockSpec((c, 2 * k * c), lambda g: (0, 0)),
            pl.BlockSpec((c, 1), lambda g: (0, 0)),
            pl.BlockSpec((c, k * c), lambda g: (0, 0)),
            pl.BlockSpec((c, 1), lambda g: (0, 0)),
        ],
        out_specs=[
            pl.BlockSpec((None, c, w), lambda g: (g, 0, 0)),
            pl.BlockSpec((None, c, 2), lambda g: (g, 0, 0)),
        ],
        out_shape=[
            jax.ShapeDtypeStruct((g_dim, c, w), jnp.bfloat16),
            jax.ShapeDtypeStruct((g_dim, c, 2), jnp.float32),
        ],
        scratch_shapes=[
            pltpu.VMEM((2 * c, w + 2 * pad), jnp.float32),   # staging [ya; enc]
            pltpu.VMEM((k * 2 * c, w), jnp.float32),         # slab for conv1
            pltpu.VMEM((c, w + 2 * pad), jnp.float32),       # staging h1
            pltpu.VMEM((k * c, w), jnp.float32),             # slab for conv2
        ],
        compiler_params=_mosaic_params(need),
    )(y_g, enc_g, mask, sc1, sh1, w1, b1, w2, b2)


# ----------------------------------------------------------------------------
# Kernel 3: BN2 (precomputed affine) + ReLU epilogue, in place over h
# ----------------------------------------------------------------------------
def bn_relu_kernel(h_ref, sc_ref, sh_ref, o_ref):
    o_ref[...] = jnp.maximum(
        h_ref[...].astype(jnp.float32) * sc_ref[...] + sh_ref[...], 0.0
    ).astype(o_ref.dtype)


def bn_relu_pallas(h_g, sc, sh):
    g_dim, c, w = h_g.shape
    need = 2 * c * w * 2 + 2 * c * 4
    return pl.pallas_call(
        bn_relu_kernel,
        grid=(g_dim,),
        in_specs=[
            pl.BlockSpec((None, c, w), lambda g: (g, 0, 0)),
            pl.BlockSpec((c, 1), lambda g: (0, 0)),
            pl.BlockSpec((c, 1), lambda g: (0, 0)),
        ],
        out_specs=pl.BlockSpec((None, c, w), lambda g: (g, 0, 0)),
        out_shape=jax.ShapeDtypeStruct((g_dim, c, w), h_g.dtype),
        input_output_aliases={0: 0},
        compiler_params=_mosaic_params(need),
    )(h_g, sc, sh)


# ----------------------------------------------------------------------------
# trace-time constant builders
# ----------------------------------------------------------------------------
def build_unpool_interp_taps(l_in, l_enc, kernel_t, stride, pad_t, pad_c, lp):
    """T_cat (L_in, KT*Lp): tap-j block occupies columns [j*Lp+pad_c, j*Lp+pad_c+L_enc),
    so the composed ConvT+interp output lands directly in the canonical segment layout
    (zero halo columns).  interpolate uses align_corners=False linear semantics."""
    l_up = (l_in - 1) * stride - 2 * pad_t + kernel_t
    m = np.zeros((l_up, l_enc), np.float32)
    scale = l_up / l_enc
    for t in range(l_enc):
        src = max((t + 0.5) * scale - 0.5, 0.0)
        i0 = min(int(np.floor(src)), l_up - 1)
        i1 = min(i0 + 1, l_up - 1)
        w1 = src - i0
        m[i0, t] += 1.0 - w1
        m[i1, t] += w1
    tcat = np.zeros((l_in, kernel_t * lp), np.float32)
    for j in range(kernel_t):
        for l in range(l_in):
            u = l * stride - pad_t + j
            if 0 <= u < l_up:
                tcat[l, j * lp + pad_c: j * lp + pad_c + l_enc] = m[u, :]
    return jnp.asarray(tcat)


# ----------------------------------------------------------------------------
# ExpansionLayer forward
# ----------------------------------------------------------------------------
def expansion_layer_forward(x, enc, params, *, pool_size, kernel_size,
                            eps=1e-5, tn_target=8):
    """x: (N, C_in, L_in) f32; enc: (N, C_out, L_enc) f32 -> (N, C_out, L_enc) f32."""
    n, c_in, l_in = x.shape
    n2, c_out, l_enc = enc.shape
    assert n2 == n

    # TODO(synk): modules.compute_convt assumed (kernel=2*pool, padding=pool//2);
    #             modules.compute_padding assumed (k-1)//2.
    kt = 2 * pool_size
    pt = pool_size // 2
    k = kernel_size
    pad_c = (kernel_size - 1) // 2
    assert k == 2 * pad_c + 1, "fused 'same' conv assumes odd kernel_size"

    tn = _choose_tn(n, tn_target)          # samples per grid step, keeps >=2 steps for v7x
    g = n // tn
    lp = l_enc + 2 * pad_c
    w = tn * lp

    # ---- trace-time constants / tiny weight re-layouts -----------------------
    tcat = build_unpool_interp_taps(l_in, l_enc, kt, pool_size, pt, pad_c, lp)
    seg = np.zeros((1, lp), np.float32)
    seg[0, pad_c:pad_c + l_enc] = 1.0
    mask = jnp.asarray(np.tile(seg, (1, tn)))                       # (1, W)

    w_up = jnp.transpose(params["w_unpool"], (1, 2, 0)).reshape(
        c_out, kt * c_in).astype(jnp.bfloat16)
    b_up = params["b_unpool"].reshape(c_out, 1).astype(jnp.float32)
    w1 = jnp.transpose(params["w_conv1"], (0, 2, 1)).reshape(
        c_out, k * 2 * c_out).astype(jnp.bfloat16)
    b1 = params["b_conv1"].reshape(c_out, 1).astype(jnp.float32)
    w2 = jnp.transpose(params["w_conv2"], (0, 2, 1)).reshape(
        c_out, k * c_out).astype(jnp.bfloat16)
    b2 = params["b_conv2"].reshape(c_out, 1).astype(jnp.float32)

    # ---- layout plumbing (pure pad/reshape/transpose at the boundary) --------
    x_g = x.astype(jnp.float32).reshape(g, tn * c_in, l_in)
    enc_g = (jnp.pad(enc.astype(jnp.float32), ((0, 0), (0, 0), (pad_c, pad_c)))
             .reshape(g, tn, c_out, lp).transpose(0, 2, 1, 3)
             .reshape(g, c_out, w).astype(jnp.bfloat16))

    # ---- K1: ConvTranspose1d + linear interp (+ BN1 partial stats) -----------
    y_g, st1 = unpool_interp_pallas(x_g, tcat, w_up, b_up, mask,
                                    tn=tn, c_in=c_in, c_out=c_out, lp=lp, kt=kt)
    cnt = float(n * l_enc)
    sc1, sh1 = _bn_affine(st1, params["g1"], params["be1"], cnt, eps)

    # ---- K2: BN1+ReLU -> conv1 (concat stays in VMEM) -> ReLU -> conv2 -------
    h_g, st2 = fused_block_pallas(y_g, enc_g, mask, sc1, sh1, w1, b1, w2, b2,
                                  k=k, pad=pad_c)
    sc2, sh2 = _bn_affine(st2, params["g2"], params["be2"], cnt, eps)

    # ---- K3: BN2 + ReLU (in place over h) -------------------------------------
    o_g = bn_relu_pallas(h_g, sc2, sh2)

    # ---- de-layout: segment layout -> (N, C, L_enc) ---------------------------
    out = (o_g.reshape(g, c_out, tn, lp).transpose(0, 2, 1, 3)
           .reshape(n, c_out, lp)[:, :, pad_c:pad_c + l_enc]).astype(jnp.float32)
    return out


# ----------------------------------------------------------------------------
# deterministic parameter init + demo
# ----------------------------------------------------------------------------
def init_params(key, input_channels, output_channels, pool_size, kernel_size):
    kt = 2 * pool_size
    ks = jax.random.split(key, 6)
    return {
        "w_unpool": 0.1 * jax.random.normal(ks[0], (input_channels, output_channels, kt), jnp.float32),
        "b_unpool": 0.1 * jax.random.normal(ks[1], (output_channels,), jnp.float32),
        "w_conv1": 0.1 * jax.random.normal(ks[2], (output_channels, 2 * output_channels, kernel_size), jnp.float32),
        "b_conv1": 0.1 * jax.random.normal(ks[3], (output_channels,), jnp.float32),
        "w_conv2": 0.1 * jax.random.normal(ks[4], (output_channels, output_channels, kernel_size), jnp.float32),
        "b_conv2": 0.1 * jax.random.normal(ks[5], (output_channels,), jnp.float32),
        "g1": jnp.ones((output_channels,), jnp.float32),
        "be1": jnp.zeros((output_channels,), jnp.float32),
        "g2": jnp.ones((output_channels,), jnp.float32),
        "be2": jnp.zeros((output_channels,), jnp.float32),
    }


if __name__ == "__main__":
    input_channels = 8
    output_channels = 8
    pool_size = 2
    kernel_size = 3
    n, l_in, l_enc = 8, 7, 16

    key = jax.random.PRNGKey(0)
    k_p, k_x, k_e = jax.random.split(key, 3)
    params = init_params(k_p, input_channels, output_channels, pool_size, kernel_size)
    x = jax.random.normal(k_x, (n, input_channels, l_in), jnp.float32)
    enc = jax.random.normal(k_e, (n, output_channels, l_enc), jnp.float32)

    fwd = jax.jit(functools.partial(expansion_layer_forward,
                                    pool_size=pool_size, kernel_size=kernel_size))
    out = jax.block_until_ready(fwd(x, enc, params))

    assert out.shape == (n, output_channels, l_enc), out.shape
    assert bool(jnp.all(jnp.isfinite(out)))
    print("KERNEL_OK")
</pallas_src>

<mosaic_0001>
module attributes {stable_mosaic.version = 11 : i64} {
  func.func @unpool_interp_kernel(%arg0: i32, %arg1: memref<1x32x7xf32, #tpu.memory_space<vmem>>, %arg2: memref<7x72xf32, #tpu.memory_space<vmem>>, %arg3: memref<8x32xbf16, #tpu.memory_space<vmem>>, %arg4: memref<8x1xf32, #tpu.memory_space<vmem>>, %arg5: memref<1x72xf32, #tpu.memory_space<vmem>>, %arg6: memref<1x8x72xbf16, #tpu.memory_space<vmem>>, %arg7: memref<1x8x2xf32, #tpu.memory_space<vmem>>, %arg8: memref<32x72xf32, #tpu.memory_space<vmem>>) attributes {dimension_semantics = [#tpu.dimension_semantics<parallel>], iteration_bounds = array<i64: 2>, scalar_prefetch = 0 : i64, scratch_operands = 1 : i64, tpu.core_type = #tpu.core_type<tc>, window_params = [{transform_indices = @transform_0, window_bounds = array<i64: 1, 32, 7>}, {pipeline_mode = #tpu.pipeline_mode<synchronous>, transform_indices = @transform_1, window_bounds = array<i64: 7, 72>}, {pipeline_mode = #tpu.pipeline_mode<synchronous>, transform_indices = @transform_2, window_bounds = array<i64: 8, 32>}, {pipeline_mode = #tpu.pipeline_mode<synchronous>, transform_indices = @transform_3, window_bounds = array<i64: 8, 1>}, {pipeline_mode = #tpu.pipeline_mode<synchronous>, transform_indices = @transform_4, window_bounds = array<i64: 1, 72>}, {transform_indices = @transform_5, window_bounds = array<i64: 1, 8, 72>}, {transform_indices = @transform_6, window_bounds = array<i64: 1, 8, 2>}]} {
    %c0 = arith.constant 0 : index
    %c0_0 = arith.constant 0 : index
    %c0_1 = arith.constant 0 : index
    %0 = vector.load %arg1[%c0, %c0_0, %c0_1] : memref<1x32x7xf32, #tpu.memory_space<vmem>>, vector<1x32x7xf32>
    %1 = vector.shape_cast %0 : vector<1x32x7xf32> to vector<32x7xf32>
    %c0_2 = arith.constant 0 : index
    %c0_3 = arith.constant 0 : index
    %2 = vector.load %arg2[%c0_2, %c0_3] : memref<7x72xf32, #tpu.memory_space<vmem>>, vector<7x72xf32>
    %cst = arith.constant dense<0.000000e+00> : vector<32x72xf32>
    %3 = tpu.matmul %1, %2, %cst {dimension_numbers = #tpu.dot_dimension_numbers<[1], [0], [0], [1], [0, 0, 1, 1], [], []>} : vector<32x7xf32>, vector<7x72xf32>, vector<32x72xf32> -> vector<32x72xf32>
    %4 = vector.extract_strided_slice %3 {offsets = [0, 0], sizes = [8, 18], strides = [1, 1]} : vector<32x72xf32> to vector<8x18xf32>
    %c0_4 = arith.constant 0 : index
    %c0_5 = arith.constant 0 : index
    %5 = vector.load %arg8[%c0_4, %c0_5] : memref<32x72xf32, #tpu.memory_space<vmem>>, vector<8x18xf32>
    tpu.vector_store %arg8[%c0_4, %c0_5], %4 {strides = array<i32>} : memref<32x72xf32, #tpu.memory_space<vmem>>, vector<8x18xf32>,
    %6 = vector.extract_strided_slice %3 {offsets = [8, 0], sizes = [8, 18], strides = [1, 1]} : vector<32x72xf32> to vector<8x18xf32>
    %c0_6 = arith.constant 0 : index
    %c18 = arith.constant 18 : index
    %7 = vector.load %arg8[%c0_6, %c18] : memref<32x72xf32, #tpu.memory_space<vmem>>, vector<8x18xf32>
    tpu.vector_store %arg8[%c0_6, %c18], %6 {strides = array<i32>} : memref<32x72xf32, #tpu.memory_space<vmem>>, vector<8x18xf32>,
    %8 = vector.extract_strided_slice %3 {offsets = [16, 0], sizes = [8, 18], strides = [1, 1]} : vector<32x72xf32> to vector<8x18xf32>
    %c0_7 = arith.constant 0 : index
    %c36 = arith.constant 36 : index
    %9 = vector.load %arg8[%c0_7, %c36] : memref<32x72xf32, #tpu.memory_space<vmem>>, vector<8x18xf32>
    tpu.vector_store %arg8[%c0_7, %c36], %8 {strides = array<i32>} : memref<32x72xf32, #tpu.memory_space<vmem>>, vector<8x18xf32>,
    %10 = vector.extract_strided_slice %3 {offsets = [24, 0], sizes = [8, 18], strides = [1, 1]} : vector<32x72xf32> to vector<8x18xf32>
    %c0_8 = arith.constant 0 : index
    %c54 = arith.constant 54 : index
    %11 = vector.load %arg8[%c0_8, %c54] : memref<32x72xf32, #tpu.memory_space<vmem>>, vector<8x18xf32>
    tpu.vector_store %arg8[%c0_8, %c54], %10 {strides = array<i32>} : memref<32x72xf32, #tpu.memory_space<vmem>>, vector<8x18xf32>,
    %12 = vector.extract_strided_slice %3 {offsets = [0, 18], sizes = [8, 18], strides = [1, 1]} : vector<32x72xf32> to vector<8x18xf32>
    %c8 = arith.constant 8 : index
    %c0_9 = arith.constant 0 : index
    %13 = vector.load %arg8[%c8, %c0_9] : memref<32x72xf32, #tpu.memory_space<vmem>>, vector<8x18xf32>
    tpu.vector_store %arg8[%c8, %c0_9], %12 {strides = array<i32>} : memref<32x72xf32, #tpu.memory_space<vmem>>, vector<8x18xf32>,
    %14 = vector.extract_strided_slice %3 {offsets = [8, 18], sizes = [8, 18], strides = [1, 1]} : vector<32x72xf32> to vector<8x18xf32>
    %c8_10 = arith.constant 8 : index
    %c18_11 = arith.constant 18 : index
    %15 = vector.load %arg8[%c8_10, %c18_11] : memref<32x72xf32, #tpu.memory_space<vmem>>, vector<8x18xf32>
    tpu.vector_store %arg8[%c8_10, %c18_11], %14 {strides = array<i32>} : memref<32x72xf32, #tpu.memory_space<vmem>>, vector<8x18xf32>,
    %16 = vector.extract_strided_slice %3 {offsets = [16, 18], sizes = [8, 18], strides = [1, 1]} : vector<32x72xf32> to vector<8x18xf32>
    %c8_12 = arith.constant 8 : index
    %c36_13 = arith.constant 36 : index
    %17 = vector.load %arg8[%c8_12, %c36_13] : memref<32x72xf32, #tpu.memory_space<vmem>>, vector<8x18xf32>
    tpu.vector_store %arg8[%c8_12, %c36_13], %16 {strides = array<i32>} : memref<32x72xf32, #tpu.memory_space<vmem>>, vector<8x18xf32>,
    %18 = vector.extract_strided_slice %3 {offsets = [24, 18], sizes = [8, 18], strides = [1, 1]} : vector<32x72xf32> to vector<8x18xf32>
    %c8_14 = arith.constant 8 : index
    %c54_15 = arith.constant 54 : index
    %19 = vector.load %arg8[%c8_14, %c54_15] : memref<32x72xf32, #tpu.memory_space<vmem>>, vector<8x18xf32>
    tpu.vector_store %arg8[%c8_14, %c54_15], %18 {strides = array<i32>} : memref<32x72xf32, #tpu.memory_space<vmem>>, vector<8x18xf32>,
    %20 = vector.extract_strided_slice %3 {offsets = [0, 36], sizes = [8, 18], strides = [1, 1]} : vector<32x72xf32> to vector<8x18xf32>
    %c16 = arith.constant 16 : index
    %c0_16 = arith.constant 0 : index
    %21 = vector.load %arg8[%c16, %c0_16] : memref<32x72xf32, #tpu.memory_space<vmem>>, vector<8x18xf32>
    tpu.vector_store %arg8[%c16, %c0_16], %20 {strides = array<i32>} : memref<32x72xf32, #tpu.memory_space<vmem>>, vector<8x18xf32>,
    %22 = vector.extract_strided_slice %3 {offsets = [8, 36], sizes = [8, 18], strides = [1, 1]} : vector<32x72xf32> to vector<8x18xf32>
    %c16_17 = arith.constant 16 : index
    %c18_18 = arith.constant 18 : index
    %23 = vector.load %arg8[%c16_17, %c18_18] : memref<32x72xf32, #tpu.memory_space<vmem>>, vector<8x18xf32>
    tpu.vector_store %arg8[%c16_17, %c18_18], %22 {strides = array<i32>} : memref<32x72xf32, #tpu.memory_space<vmem>>, vector<8x18xf32>,
    %24 = vector.extract_strided_slice %3 {offsets = [16, 36], sizes = [8, 18], strides = [1, 1]} : vector<32x72xf32> to vector<8x18xf32>
    %c16_19 = arith.constant 16 : index
    %c36_20 = arith.constant 36 : index
    %25 = vector.load %arg8[%c16_19, %c36_20] : memref<32x72xf32, #tpu.memory_space<vmem>>, vector<8x18xf32>
    tpu.vector_store %arg8[%c16_19, %c36_20], %24 {strides = array<i32>} : memref<32x72xf32, #tpu.memory_space<vmem>>, vector<8x18xf32>,
    %26 = vector.extract_strided_slice %3 {offsets = [24, 36], sizes = [8, 18], strides = [1, 1]} : vector<32x72xf32> to vector<8x18xf32>
    %c16_21 = arith.constant 16 : index
    %c54_22 = arith.constant 54 : index
    %27 = vector.load %arg8[%c16_21, %c54_22] : memref<32x72xf32, #tpu.memory_space<vmem>>, vector<8x18xf32>
    tpu.vector_store %arg8[%c16_21, %c54_22], %26 {strides = array<i32>} : memref<32x72xf32, #tpu.memory_space<vmem>>, vector<8x18xf32>,
    %28 = vector.extract_strided_slice %3 {offsets = [0, 54], sizes = [8, 18], strides = [1, 1]} : vector<32x72xf32> to vector<8x18xf32>
    %c24 = arith.constant 24 : index
    %c0_23 = arith.constant 0 : index
    %29 = vector.load %arg8[%c24, %c0_23] : memref<32x72xf32, #tpu.memory_space<vmem>>, vector<8x18xf32>
    tpu.vector_store %arg8[%c24, %c0_23], %28 {strides = array<i32>} : memref<32x72xf32, #tpu.memory_space<vmem>>, vector<8x18xf32>,
    %30 = vector.extract_strided_slice %3 {offsets = [8, 54], sizes = [8, 18], strides = [1, 1]} : vector<32x72xf32> to vector<8x18xf32>
    %c24_24 = arith.constant 24 : index
    %c18_25 = arith.constant 18 : index
    %31 = vector.load %arg8[%c24_24, %c18_25] : memref<32x72xf32, #tpu.memory_space<vmem>>, vector<8x18xf32>
    tpu.vector_store %arg8[%c24_24, %c18_25], %30 {strides = array<i32>} : memref<32x72xf32, #tpu.memory_space<vmem>>, vector<8x18xf32>,
    %32 = vector.extract_strided_slice %3 {offsets = [16, 54], sizes = [8, 18], strides = [1, 1]} : vector<32x72xf32> to vector<8x18xf32>
    %c24_26 = arith.constant 24 : index
    %c36_27 = arith.constant 36 : index
    %33 = vector.load %arg8[%c24_26, %c36_27] : memref<32x72xf32, #tpu.memory_space<vmem>>, vector<8x18xf32>
    tpu.vector_store %arg8[%c24_26, %c36_27], %32 {strides = array<i32>} : memref<32x72xf32, #tpu.memory_space<vmem>>, vector<8x18xf32>,
    %34 = vector.extract_strided_slice %3 {offsets = [24, 54], sizes = [8, 18], strides = [1, 1]} : vector<32x72xf32> to vector<8x18xf32>
    %c24_28 = arith.constant 24 : index
    %c54_29 = arith.constant 54 : index
    %35 = vector.load %arg8[%c24_28, %c54_29] : memref<32x72xf32, #tpu.memory_space<vmem>>, vector<8x18xf32>
    tpu.vector_store %arg8[%c24_28, %c54_29], %34 {strides = array<i32>} : memref<32x72xf32, #tpu.memory_space<vmem>>, vector<8x18xf32>,
    %c0_30 = arith.constant 0 : index
    %c0_31 = arith.constant 0 : index
    %36 = vector.load %arg3[%c0_30, %c0_31] : memref<8x32xbf16, #tpu.memory_space<vmem>>, vector<8x32xbf16>
    %c0_32 = arith.constant 0 : index
    %c0_33 = arith.constant 0 : index
    %37 = vector.load %arg8[%c0_32, %c0_33] : memref<32x72xf32, #tpu.memory_space<vmem>>, vector<32x72xf32>
    %38 = arith.truncf %37 : vector<32x72xf32> to vector<32x72xbf16>
    %cst_34 = arith.constant dense<0.000000e+00> : vector<8x72xf32>
    %39 = tpu.matmul %36, %38, %cst_34 {dimension_numbers = #tpu.dot_dimension_numbers<[1], [0], [0], [1], [0, 0, 1, 1], [], []>} : vector<8x32xbf16>, vector<32x72xbf16>, vector<8x72xf32> -> vector<8x72xf32>
    %c0_35 = arith.constant 0 : index
    %c0_36 = arith.constant 0 : index
    %40 = vector.load %arg4[%c0_35, %c0_36] : memref<8x1xf32, #tpu.memory_space<vmem>>, vector<8x1xf32>
    %41 = vector.broadcast %40 : vector<8x1xf32> to vector<8x72xf32>
    %42 = arith.addf %39, %41 : vector<8x72xf32>
    %c0_37 = arith.constant 0 : index
    %c0_38 = arith.constant 0 : index
    %43 = vector.load %arg5[%c0_37, %c0_38] : memref<1x72xf32, #tpu.memory_space<vmem>>, vector<1x72xf32>
    %44 = vector.broadcast %43 : vector<1x72xf32> to vector<8x72xf32>
    %45 = arith.mulf %42, %44 : vector<8x72xf32>
    %46 = arith.truncf %45 : vector<8x72xf32> to vector<8x72xbf16>
    %c0_39 = arith.constant 0 : index
    %c0_40 = arith.constant 0 : index
    %c0_41 = arith.constant 0 : index
    %47 = vector.load %arg6[%c0_39, %c0_40, %c0_41] : memref<1x8x72xbf16, #tpu.memory_space<vmem>>, vector<1x8x72xbf16>
    %48 = vector.shape_cast %47 : vector<1x8x72xbf16> to vector<8x72xbf16>
    %49 = vector.shape_cast %46 : vector<8x72xbf16> to vector<1x8x72xbf16>
    tpu.vector_store %arg6[%c0_39, %c0_40, %c0_41], %49 {strides = array<i32>} : memref<1x8x72xbf16, #tpu.memory_space<vmem>>, vector<1x8x72xbf16>,
    %cst_42 = arith.constant dense<0.000000e+00> : vector<8xf32>
    %50 = vector.multi_reduction <add>, %45, %cst_42 [1] : vector<8x72xf32> to vector<8xf32>
    %51 = vector.shape_cast %50 : vector<8xf32> to vector<8x1xf32>
    %c0_43 = arith.constant 0 : index
    %c0_44 = arith.constant 0 : index
    %c0_45 = arith.constant 0 : index
    %52 = vector.load %arg7[%c0_43, %c0_44, %c0_45] : memref<1x8x2xf32, #tpu.memory_space<vmem>>, vector<1x8x1xf32>
    %53 = vector.shape_cast %52 : vector<1x8x1xf32> to vector<8x1xf32>
    %54 = vector.shape_cast %51 : vector<8x1xf32> to vector<1x8x1xf32>
    tpu.vector_store %arg7[%c0_43, %c0_44, %c0_45], %54 {strides = array<i32>} : memref<1x8x2xf32, #tpu.memory_space<vmem>>, vector<1x8x1xf32>,
    %55 = arith.mulf %45, %45 : vector<8x72xf32>
    %cst_46 = arith.constant dense<0.000000e+00> : vector<8xf32>
    %56 = vector.multi_reduction <add>, %55, %cst_46 [1] : vector<8x72xf32> to vector<8xf32>
    %57 = vector.shape_cast %56 : vector<8xf32> to vector<8x1xf32>
    %c0_47 = arith.constant 0 : index
    %c0_48 = arith.constant 0 : index
    %c1 = arith.constant 1 : index
    %58 = vector.load %arg7[%c0_47, %c0_48, %c1] : memref<1x8x2xf32, #tpu.memory_space<vmem>>, vector<1x8x1xf32>
    %59 = vector.shape_cast %58 : vector<1x8x1xf32> to vector<8x1xf32>
    %60 = vector.shape_cast %57 : vector<8x1xf32> to vector<1x8x1xf32>
    tpu.vector_store %arg7[%c0_47, %c0_48, %c1], %60 {strides = array<i32>} : memref<1x8x2xf32, #tpu.memory_space<vmem>>, vector<1x8x1xf32>,
    return
  }
  func.func @transform_0(%arg0: i32) -> (i32, i32, i32) {
    %c0_i32 = arith.constant 0 : i32
    %c0_i32_0 = arith.constant 0 : i32
    %c0_i32_1 = arith.constant 0 : i32
    return %arg0, %c0_i32, %c0_i32_0 : i32, i32, i32
  }
  func.func @transform_1(%arg0: i32) -> (i32, i32) {
    %c0_i32 = arith.constant 0 : i32
    %c0_i32_0 = arith.constant 0 : i32
    %c0_i32_1 = arith.constant 0 : i32
    return %c0_i32, %c0_i32_0 : i32, i32
  }
  func.func @transform_2(%arg0: i32) -> (i32, i32) {
    %c0_i32 = arith.constant 0 : i32
    %c0_i32_0 = arith.constant 0 : i32
    %c0_i32_1 = arith.constant 0 : i32
    return %c0_i32, %c0_i32_0 : i32, i32
  }
  func.func @transform_3(%arg0: i32) -> (i32, i32) {
    %c0_i32 = arith.constant 0 : i32
    %c0_i32_0 = arith.constant 0 : i32
    %c0_i32_1 = arith.constant 0 : i32
    return %c0_i32, %c0_i32_0 : i32, i32
  }
  func.func @transform_4(%arg0: i32) -> (i32, i32) {
    %c0_i32 = arith.constant 0 : i32
    %c0_i32_0 = arith.constant 0 : i32
    %c0_i32_1 = arith.constant 0 : i32
    return %c0_i32, %c0_i32_0 : i32, i32
  }
  func.func @transform_5(%arg0: i32) -> (i32, i32, i32) {
    %c0_i32 = arith.constant 0 : i32
    %c0_i32_0 = arith.constant 0 : i32
    %c0_i32_1 = arith.constant 0 : i32
    return %arg0, %c0_i32, %c0_i32_0 : i32, i32, i32
  }
  func.func @transform_6(%arg0: i32) -> (i32, i32, i32) {
    %c0_i32 = arith.constant 0 : i32
    %c0_i32_0 = arith.constant 0 : i32
    %c0_i32_1 = arith.constant 0 : i32
    return %arg0, %c0_i32, %c0_i32_0 : i32, i32, i32
  }
}

module attributes {stable_mosaic.version = 11 : i64} {
  func.func @bn_relu_kernel(%arg0: i32, %arg1: memref<1x8x72xbf16, #tpu.memory_space<vmem>>, %arg2: memref<8x1xf32, #tpu.memory_space<vmem>>, %arg3: memref<8x1xf32, #tpu.memory_space<vmem>>, %arg4: memref<1x8x72xbf16, #tpu.memory_space<vmem>>) attributes {dimension_semantics = [#tpu.dimension_semantics<parallel>], iteration_bounds = array<i64: 2>, scalar_prefetch = 0 : i64, scratch_operands = 0 : i64, tpu.core_type = #tpu.core_type<tc>, window_params = [{transform_indices = @transform_0, window_bounds = array<i64: 1, 8, 72>}, {pipeline_mode = #tpu.pipeline_mode<synchronous>, transform_indices = @transform_1, window_bounds = array<i64: 8, 1>}, {pipeline_mode = #tpu.pipeline_mode<synchronous>, transform_indices = @transform_2, window_bounds = array<i64: 8, 1>}, {transform_indices = @transform_3, window_bounds = array<i64: 1, 8, 72>}]} {
    %c0 = arith.constant 0 : index
    %c0_0 = arith.constant 0 : index
    %c0_1 = arith.constant 0 : index
    %0 = vector.load %arg1[%c0, %c0_0, %c0_1] : memref<1x8x72xbf16, #tpu.memory_space<vmem>>, vector<1x8x72xbf16>
    %1 = vector.shape_cast %0 : vector<1x8x72xbf16> to vector<8x72xbf16>
    %2 = arith.extf %1 : vector<8x72xbf16> to vector<8x72xf32>
    %c0_2 = arith.constant 0 : index
    %c0_3 = arith.constant 0 : index
    %3 = vector.load %arg2[%c0_2, %c0_3] : memref<8x1xf32, #tpu.memory_space<vmem>>, vector<8x1xf32>
    %4 = vector.broadcast %3 : vector<8x1xf32> to vector<8x72xf32>
    %5 = arith.mulf %2, %4 : vector<8x72xf32>
    %c0_4 = arith.constant 0 : index
    %c0_5 = arith.constant 0 : index
    %6 = vector.load %arg3[%c0_4, %c0_5] : memref<8x1xf32, #tpu.memory_space<vmem>>, vector<8x1xf32>
    %7 = vector.broadcast %6 : vector<8x1xf32> to vector<8x72xf32>
    %8 = arith.addf %5, %7 : vector<8x72xf32>
    %cst = arith.constant 0.000000e+00 : f32
    %9 = vector.broadcast %cst : f32 to vector<8x72xf32>
    %10 = arith.maximumf %8, %9 : vector<8x72xf32>
    %11 = arith.truncf %10 : vector<8x72xf32> to vector<8x72xbf16>
    %c0_6 = arith.constant 0 : index
    %c0_7 = arith.constant 0 : index
    %c0_8 = arith.constant 0 : index
    %12 = vector.load %arg4[%c0_6, %c0_7, %c0_8] : memref<1x8x72xbf16, #tpu.memory_space<vmem>>, vector<1x8x72xbf16>
    %13 = vector.shape_cast %12 : vector<1x8x72xbf16> to vector<8x72xbf16>
    %14 = vector.shape_cast %11 : vector<8x72xbf16> to vector<1x8x72xbf16>
    tpu.vector_store %arg4[%c0_6, %c0_7, %c0_8], %14 {strides = array<i32>} : memref<1x8x72xbf16, #tpu.memory_space<vmem>>, vector<1x8x72xbf16>,
    return
  }
  func.func @transform_0(%arg0: i32) -> (i32, i32, i32) {
    %c0_i32 = arith.constant 0 : i32
    %c0_i32_0 = arith.constant 0 : i32
    %c0_i32_1 = arith.constant 0 : i32
    return %arg0, %c0_i32, %c0_i32_0 : i32, i32, i32
  }
  func.func @transform_1(%arg0: i32) -> (i32, i32) {
    %c0_i32 = arith.constant 0 : i32
    %c0_i32_0 = arith.constant 0 : i32
    %c0_i32_1 = arith.constant 0 : i32
    return %c0_i32, %c0_i32_0 : i32, i32
  }
  func.func @transform_2(%arg0: i32) -> (i32, i32) {
    %c0_i32 = arith.constant 0 : i32
    %c0_i32_0 = arith.constant 0 : i32
    %c0_i32_1 = arith.constant 0 : i32
    return %c0_i32, %c0_i32_0 : i32, i32
  }
  func.func @transform_3(%arg0: i32) -> (i32, i32, i32) {
    %c0_i32 = arith.constant 0 : i32
    %c0_i32_0 = arith.constant 0 : i32
    %c0_i32_1 = arith.constant 0 : i32
    return %arg0, %c0_i32, %c0_i32_0 : i32, i32, i32
  }
}

module attributes {stable_mosaic.version = 11 : i64} {
  func.func @fused_block_kernel(%arg0: i32, %arg1: memref<1x8x72xbf16, #tpu.memory_space<vmem>>, %arg2: memref<1x8x72xbf16, #tpu.memory_space<vmem>>, %arg3: memref<1x72xf32, #tpu.memory_space<vmem>>, %arg4: memref<8x1xf32, #tpu.memory_space<vmem>>, %arg5: memref<8x1xf32, #tpu.memory_space<vmem>>, %arg6: memref<8x48xbf16, #tpu.memory_space<vmem>>, %arg7: memref<8x1xf32, #tpu.memory_space<vmem>>, %arg8: memref<8x24xbf16, #tpu.memory_space<vmem>>, %arg9: memref<8x1xf32, #tpu.memory_space<vmem>>, %arg10: memref<1x8x72xbf16, #tpu.memory_space<vmem>>, %arg11: memref<1x8x2xf32, #tpu.memory_space<vmem>>, %arg12: memref<16x74xf32, #tpu.memory_space<vmem>>, %arg13: memref<48x72xf32, #tpu.memory_space<vmem>>, %arg14: memref<8x74xf32, #tpu.memory_space<vmem>>, %arg15: memref<24x72xf32, #tpu.memory_space<vmem>>) attributes {dimension_semantics = [#tpu.dimension_semantics<parallel>], iteration_bounds = array<i64: 2>, scalar_prefetch = 0 : i64, scratch_operands = 4 : i64, tpu.core_type = #tpu.core_type<tc>, window_params = [{transform_indices = @transform_0, window_bounds = array<i64: 1, 8, 72>}, {transform_indices = @transform_1, window_bounds = array<i64: 1, 8, 72>}, {pipeline_mode = #tpu.pipeline_mode<synchronous>, transform_indices = @transform_2, window_bounds = array<i64: 1, 72>}, {pipeline_mode = #tpu.pipeline_mode<synchronous>, transform_indices = @transform_3, window_bounds = array<i64: 8, 1>}, {pipeline_mode = #tpu.pipeline_mode<synchronous>, transform_indices = @transform_4, window_bounds = array<i64: 8, 1>}, {pipeline_mode = #tpu.pipeline_mode<synchronous>, transform_indices = @transform_5, window_bounds = array<i64: 8, 48>}, {pipeline_mode = #tpu.pipeline_mode<synchronous>, transform_indices = @transform_6, window_bounds = array<i64: 8, 1>}, {pipeline_mode = #tpu.pipeline_mode<synchronous>, transform_indices = @transform_7, window_bounds = array<i64: 8, 24>}, {pipeline_mode = #tpu.pipeline_mode<synchronous>, transform_indices = @transform_8, window_bounds = array<i64: 8, 1>}, {transform_indices = @transform_9, window_bounds = array<i64: 1, 8, 72>}, {transform_indices = @transform_10, window_bounds = array<i64: 1, 8, 2>}]} {
    %c0 = arith.constant 0 : index
    %c0_0 = arith.constant 0 : index
    %0 = vector.load %arg3[%c0, %c0_0] : memref<1x72xf32, #tpu.memory_space<vmem>>, vector<1x72xf32>
    %c0_1 = arith.constant 0 : index
    %c0_2 = arith.constant 0 : index
    %c0_3 = arith.constant 0 : index
    %1 = vector.load %arg1[%c0_1, %c0_2, %c0_3] : memref<1x8x72xbf16, #tpu.memory_space<vmem>>, vector<1x8x72xbf16>
    %2 = vector.shape_cast %1 : vector<1x8x72xbf16> to vector<8x72xbf16>
    %3 = arith.extf %2 : vector<8x72xbf16> to vector<8x72xf32>
    %c0_4 = arith.constant 0 : index
    %c0_5 = arith.constant 0 : index
    %4 = vector.load %arg4[%c0_4, %c0_5] : memref<8x1xf32, #tpu.memory_space<vmem>>, vector<8x1xf32>
    %5 = vector.broadcast %4 : vector<8x1xf32> to vector<8x72xf32>
    %6 = arith.mulf %3, %5 : vector<8x72xf32>
    %c0_6 = arith.constant 0 : index
    %c0_7 = arith.constant 0 : index
    %7 = vector.load %arg5[%c0_6, %c0_7] : memref<8x1xf32, #tpu.memory_space<vmem>>, vector<8x1xf32>
    %8 = vector.broadcast %7 : vector<8x1xf32> to vector<8x72xf32>
    %9 = arith.addf %6, %8 : vector<8x72xf32>
    %cst = arith.constant 0.000000e+00 : f32
    %10 = vector.broadcast %cst : f32 to vector<8x72xf32>
    %11 = arith.maximumf %9, %10 : vector<8x72xf32>
    %12 = vector.broadcast %0 : vector<1x72xf32> to vector<8x72xf32>
    %13 = arith.mulf %11, %12 : vector<8x72xf32>
    %cst_8 = arith.constant 0.000000e+00 : f32
    %14 = vector.broadcast %cst_8 : f32 to vector<16x1xf32>
    %c0_9 = arith.constant 0 : index
    %c0_10 = arith.constant 0 : index
    %15 = vector.load %arg12[%c0_9, %c0_10] : memref<16x74xf32, #tpu.memory_space<vmem>>, vector<16x1xf32>
    tpu.vector_store %arg12[%c0_9, %c0_10], %14 {strides = array<i32>} : memref<16x74xf32, #tpu.memory_space<vmem>>, vector<16x1xf32>,
    %c0_11 = arith.constant 0 : index
    %c73 = arith.constant 73 : index
    %16 = vector.load %arg12[%c0_11, %c73] : memref<16x74xf32, #tpu.memory_space<vmem>>, vector<16x1xf32>
    tpu.vector_store %arg12[%c0_11, %c73], %14 {strides = array<i32>} : memref<16x74xf32, #tpu.memory_space<vmem>>, vector<16x1xf32>,
    %c0_12 = arith.constant 0 : index
    %c1 = arith.constant 1 : index
    %17 = vector.load %arg12[%c0_12, %c1] : memref<16x74xf32, #tpu.memory_space<vmem>>, vector<8x72xf32>
    tpu.vector_store %arg12[%c0_12, %c1], %13 {strides = array<i32>} : memref<16x74xf32, #tpu.memory_space<vmem>>, vector<8x72xf32>,
    %c0_13 = arith.constant 0 : index
    %c0_14 = arith.constant 0 : index
    %c0_15 = arith.constant 0 : index
    %18 = vector.load %arg2[%c0_13, %c0_14, %c0_15] : memref<1x8x72xbf16, #tpu.memory_space<vmem>>, vector<1x8x72xbf16>
    %19 = vector.shape_cast %18 : vector<1x8x72xbf16> to vector<8x72xbf16>
    %20 = arith.extf %19 : vector<8x72xbf16> to vector<8x72xf32>
    %c8 = arith.constant 8 : index
    %c1_16 = arith.constant 1 : index
    %21 = vector.load %arg12[%c8, %c1_16] : memref<16x74xf32, #tpu.memory_space<vmem>>, vector<8x72xf32>
    tpu.vector_store %arg12[%c8, %c1_16], %20 {strides = array<i32>} : memref<16x74xf32, #tpu.memory_space<vmem>>, vector<8x72xf32>,
    %c0_17 = arith.constant 0 : index
    %c0_18 = arith.constant 0 : index
    %22 = vector.load %arg12[%c0_17, %c0_18] : memref<16x74xf32, #tpu.memory_space<vmem>>, vector<16x72xf32>
    %c0_19 = arith.constant 0 : index
    %c0_20 = arith.constant 0 : index
    %23 = vector.load %arg13[%c0_19, %c0_20] : memref<48x72xf32, #tpu.memory_space<vmem>>, vector<16x72xf32>
    tpu.vector_store %arg13[%c0_19, %c0_20], %22 {strides = array<i32>} : memref<48x72xf32, #tpu.memory_space<vmem>>, vector<16x72xf32>,
    %c0_21 = arith.constant 0 : index
    %c1_22 = arith.constant 1 : index
    %24 = vector.load %arg12[%c0_21, %c1_22] : memref<16x74xf32, #tpu.memory_space<vmem>>, vector<16x72xf32>
    %c16 = arith.constant 16 : index
    %c0_23 = arith.constant 0 : index
    %25 = vector.load %arg13[%c16, %c0_23] : memref<48x72xf32, #tpu.memory_space<vmem>>, vector<16x72xf32>
    tpu.vector_store %arg13[%c16, %c0_23], %24 {strides = array<i32>} : memref<48x72xf32, #tpu.memory_space<vmem>>, vector<16x72xf32>,
    %c0_24 = arith.constant 0 : index
    %c2 = arith.constant 2 : index
    %26 = vector.load %arg12[%c0_24, %c2] : memref<16x74xf32, #tpu.memory_space<vmem>>, vector<16x72xf32>
    %c32 = arith.constant 32 : index
    %c0_25 = arith.constant 0 : index
    %27 = vector.load %arg13[%c32, %c0_25] : memref<48x72xf32, #tpu.memory_space<vmem>>, vector<16x72xf32>
    tpu.vector_store %arg13[%c32, %c0_25], %26 {strides = array<i32>} : memref<48x72xf32, #tpu.memory_space<vmem>>, vector<16x72xf32>,
    %c0_26 = arith.constant 0 : index
    %c0_27 = arith.constant 0 : index
    %28 = vector.load %arg6[%c0_26, %c0_27] : memref<8x48xbf16, #tpu.memory_space<vmem>>, vector<8x48xbf16>
    %c0_28 = arith.constant 0 : index
    %c0_29 = arith.constant 0 : index
    %29 = vector.load %arg13[%c0_28, %c0_29] : memref<48x72xf32, #tpu.memory_space<vmem>>, vector<48x72xf32>
    %30 = arith.truncf %29 : vector<48x72xf32> to vector<48x72xbf16>
    %cst_30 = arith.constant dense<0.000000e+00> : vector<8x72xf32>
    %31 = tpu.matmul %28, %30, %cst_30 {dimension_numbers = #tpu.dot_dimension_numbers<[1], [0], [0], [1], [0, 0, 1, 1], [], []>} : vector<8x48xbf16>, vector<48x72xbf16>, vector<8x72xf32> -> vector<8x72xf32>
    %c0_31 = arith.constant 0 : index
    %c0_32 = arith.constant 0 : index
    %32 = vector.load %arg7[%c0_31, %c0_32] : memref<8x1xf32, #tpu.memory_space<vmem>>, vector<8x1xf32>
    %33 = vector.broadcast %32 : vector<8x1xf32> to vector<8x72xf32>
    %34 = arith.addf %31, %33 : vector<8x72xf32>
    %cst_33 = arith.constant 0.000000e+00 : f32
    %35 = vector.broadcast %cst_33 : f32 to vector<8x72xf32>
    %36 = arith.maximumf %34, %35 : vector<8x72xf32>
    %37 = vector.broadcast %0 : vector<1x72xf32> to vector<8x72xf32>
    %38 = arith.mulf %36, %37 : vector<8x72xf32>
    %cst_34 = arith.constant 0.000000e+00 : f32
    %39 = vector.broadcast %cst_34 : f32 to vector<8x1xf32>
    %c0_35 = arith.constant 0 : index
    %c0_36 = arith.constant 0 : index
    %40 = vector.load %arg14[%c0_35, %c0_36] : memref<8x74xf32, #tpu.memory_space<vmem>>, vector<8x1xf32>
    tpu.vector_store %arg14[%c0_35, %c0_36], %39 {strides = array<i32>} : memref<8x74xf32, #tpu.memory_space<vmem>>, vector<8x1xf32>,
    %c0_37 = arith.constant 0 : index
    %c73_38 = arith.constant 73 : index
    %41 = vector.load %arg14[%c0_37, %c73_38] : memref<8x74xf32, #tpu.memory_space<vmem>>, vector<8x1xf32>
    tpu.vector_store %arg14[%c0_37, %c73_38], %39 {strides = array<i32>} : memref<8x74xf32, #tpu.memory_space<vmem>>, vector<8x1xf32>,
    %c0_39 = arith.constant 0 : index
    %c1_40 = arith.constant 1 : index
    %42 = vector.load %arg14[%c0_39, %c1_40] : memref<8x74xf32, #tpu.memory_space<vmem>>, vector<8x72xf32>
    tpu.vector_store %arg14[%c0_39, %c1_40], %38 {strides = array<i32>} : memref<8x74xf32, #tpu.memory_space<vmem>>, vector<8x72xf32>,
    %c0_41 = arith.constant 0 : index
    %c0_42 = arith.constant 0 : index
    %43 = vector.load %arg14[%c0_41, %c0_42] : memref<8x74xf32, #tpu.memory_space<vmem>>, vector<8x72xf32>
    %c0_43 = arith.constant 0 : index
    %c0_44 = arith.constant 0 : index
    %44 = vector.load %arg15[%c0_43, %c0_44] : memref<24x72xf32, #tpu.memory_space<vmem>>, vector<8x72xf32>
    tpu.vector_store %arg15[%c0_43, %c0_44], %43 {strides = array<i32>} : memref<24x72xf32, #tpu.memory_space<vmem>>, vector<8x72xf32>,
    %c0_45 = arith.constant 0 : index
    %c1_46 = arith.constant 1 : index
    %45 = vector.load %arg14[%c0_45, %c1_46] : memref<8x74xf32, #tpu.memory_space<vmem>>, vector<8x72xf32>
    %c8_47 = arith.constant 8 : index
    %c0_48 = arith.constant 0 : index
    %46 = vector.load %arg15[%c8_47, %c0_48] : memref<24x72xf32, #tpu.memory_space<vmem>>, vector<8x72xf32>
    tpu.vector_store %arg15[%c8_47, %c0_48], %45 {strides = array<i32>} : memref<24x72xf32, #tpu.memory_space<vmem>>, vector<8x72xf32>,
    %c0_49 = arith.constant 0 : index
    %c2_50 = arith.constant 2 : index
    %47 = vector.load %arg14[%c0_49, %c2_50] : memref<8x74xf32, #tpu.memory_space<vmem>>, vector<8x72xf32>
    %c16_51 = arith.constant 16 : index
    %c0_52 = arith.constant 0 : index
    %48 = vector.load %arg15[%c16_51, %c0_52] : memref<24x72xf32, #tpu.memory_space<vmem>>, vector<8x72xf32>
    tpu.vector_store %arg15[%c16_51, %c0_52], %47 {strides = array<i32>} : memref<24x72xf32, #tpu.memory_space<vmem>>, vector<8x72xf32>,
    %c0_53 = arith.constant 0 : index
    %c0_54 = arith.constant 0 : index
    %49 = vector.load %arg8[%c0_53, %c0_54] : memref<8x24xbf16, #tpu.memory_space<vmem>>, vector<8x24xbf16>
    %c0_55 = arith.constant 0 : index
    %c0_56 = arith.constant 0 : index
    %50 = vector.load %arg15[%c0_55, %c0_56] : memref<24x72xf32, #tpu.memory_space<vmem>>, vector<24x72xf32>
    %51 = arith.truncf %50 : vector<24x72xf32> to vector<24x72xbf16>
    %cst_57 = arith.constant dense<0.000000e+00> : vector<8x72xf32>
    %52 = tpu.matmul %49, %51, %cst_57 {dimension_numbers = #tpu.dot_dimension_numbers<[1], [0], [0], [1], [0, 0, 1, 1], [], []>} : vector<8x24xbf16>, vector<24x72xbf16>, vector<8x72xf32> -> vector<8x72xf32>
    %c0_58 = arith.constant 0 : index
    %c0_59 = arith.constant 0 : index
    %53 = vector.load %arg9[%c0_58, %c0_59] : memref<8x1xf32, #tpu.memory_space<vmem>>, vector<8x1xf32>
    %54 = vector.broadcast %53 : vector<8x1xf32> to vector<8x72xf32>
    %55 = arith.addf %52, %54 : vector<8x72xf32>
    %56 = vector.broadcast %0 : vector<1x72xf32> to vector<8x72xf32>
    %57 = arith.mulf %55, %56 : vector<8x72xf32>
    %58 = arith.truncf %57 : vector<8x72xf32> to vector<8x72xbf16>
    %c0_60 = arith.constant 0 : index
    %c0_61 = arith.constant 0 : index
    %c0_62 = arith.constant 0 : index
    %59 = vector.load %arg10[%c0_60, %c0_61, %c0_62] : memref<1x8x72xbf16, #tpu.memory_space<vmem>>, vector<1x8x72xbf16>
    %60 = vector.shape_cast %59 : vector<1x8x72xbf16> to vector<8x72xbf16>
    %61 = vector.shape_cast %58 : vector<8x72xbf16> to vector<1x8x72xbf16>
    tpu.vector_store %arg10[%c0_60, %c0_61, %c0_62], %61 {strides = array<i32>} : memref<1x8x72xbf16, #tpu.memory_space<vmem>>, vector<1x8x72xbf16>,
    %cst_63 = arith.constant dense<0.000000e+00> : vector<8xf32>
    %62 = vector.multi_reduction <add>, %57, %cst_63 [1] : vector<8x72xf32> to vector<8xf32>
    %63 = vector.shape_cast %62 : vector<8xf32> to vector<8x1xf32>
    %c0_64 = arith.constant 0 : index
    %c0_65 = arith.constant 0 : index
    %c0_66 = arith.constant 0 : index
    %64 = vector.load %arg11[%c0_64, %c0_65, %c0_66] : memref<1x8x2xf32, #tpu.memory_space<vmem>>, vector<1x8x1xf32>
    %65 = vector.shape_cast %64 : vector<1x8x1xf32> to vector<8x1xf32>
    %66 = vector.shape_cast %63 : vector<8x1xf32> to vector<1x8x1xf32>
    tpu.vector_store %arg11[%c0_64, %c0_65, %c0_66], %66 {strides = array<i32>} : memref<1x8x2xf32, #tpu.memory_space<vmem>>, vector<1x8x1xf32>,
    %67 = arith.mulf %57, %57 : vector<8x72xf32>
    %cst_67 = arith.constant dense<0.000000e+00> : vector<8xf32>
    %68 = vector.multi_reduction <add>, %67, %cst_67 [1] : vector<8x72xf32> to vector<8xf32>
    %69 = vector.shape_cast %68 : vector<8xf32> to vector<8x1xf32>
    %c0_68 = arith.constant 0 : index
    %c0_69 = arith.constant 0 : index
    %c1_70 = arith.constant 1 : index
    %70 = vector.load %arg11[%c0_68, %c0_69, %c1_70] : memref<1x8x2xf32, #tpu.memory_space<vmem>>, vector<1x8x1xf32>
    %71 = vector.shape_cast %70 : vector<1x8x1xf32> to vector<8x1xf32>
    %72 = vector.shape_cast %69 : vector<8x1xf32> to vector<1x8x1xf32>
    tpu.vector_store %arg11[%c0_68, %c0_69, %c1_70], %72 {strides = array<i32>} : memref<1x8x2xf32, #tpu.memory_space<vmem>>, vector<1x8x1xf32>,
    return
  }
  func.func @transform_0(%arg0: i32) -> (i32, i32, i32) {
    %c0_i32 = arith.constant 0 : i32
    %c0_i32_0 = arith.constant 0 : i32
    %c0_i32_1 = arith.constant 0 : i32
    return %arg0, %c0_i32, %c0_i32_0 : i32, i32, i32
  }
  func.func @transform_1(%arg0: i32) -> (i32, i32, i32) {
    %c0_i32 = arith.constant 0 : i32
    %c0_i32_0 = arith.constant 0 : i32
    %c0_i32_1 = arith.constant 0 : i32
    return %arg0, %c0_i32, %c0_i32_0 : i32, i32, i32
  }
  func.func @transform_2(%arg0: i32) -> (i32, i32) {
    %c0_i32 = arith.constant 0 : i32
    %c0_i32_0 = arith.constant 0 : i32
    %c0_i32_1 = arith.constant 0 : i32
    return %c0_i32, %c0_i32_0 : i32, i32
  }
  func.func @transform_3(%arg0: i32) -> (i32, i32) {
    %c0_i32 = arith.constant 0 : i32
    %c0_i32_0 = arith.constant 0 : i32
    %c0_i32_1 = arith.constant 0 : i32
    return %c0_i32, %c0_i32_0 : i32, i32
  }
  func.func @transform_4(%arg0: i32) -> (i32, i32) {
    %c0_i32 = arith.constant 0 : i32
    %c0_i32_0 = arith.constant 0 : i32
    %c0_i32_1 = arith.constant 0 : i32
    return %c0_i32, %c0_i32_0 : i32, i32
  }
  func.func @transform_5(%arg0: i32) -> (i32, i32) {
    %c0_i32 = arith.constant 0 : i32
    %c0_i32_0 = arith.constant 0 : i32
    %c0_i32_1 = arith.constant 0 : i32
    return %c0_i32, %c0_i32_0 : i32, i32
  }
  func.func @transform_6(%arg0: i32) -> (i32, i32) {
    %c0_i32 = arith.constant 0 : i32
    %c0_i32_0 = arith.constant 0 : i32
    %c0_i32_1 = arith.constant 0 : i32
    return %c0_i32, %c0_i32_0 : i32, i32
  }
  func.func @transform_7(%arg0: i32) -> (i32, i32) {
    %c0_i32 = arith.constant 0 : i32
    %c0_i32_0 = arith.constant 0 : i32
    %c0_i32_1 = arith.constant 0 : i32
    return %c0_i32, %c0_i32_0 : i32, i32
  }
  func.func @transform_8(%arg0: i32) -> (i32, i32) {
    %c0_i32 = arith.constant 0 : i32
    %c0_i32_0 = arith.constant 0 : i32
    %c0_i32_1 = arith.constant 0 : i32
    return %c0_i32, %c0_i32_0 : i32, i32
  }
  func.func @transform_9(%arg0: i32) -> (i32, i32, i32) {
    %c0_i32 = arith.constant 0 : i32
    %c0_i32_0 = arith.constant 0 : i32
    %c0_i32_1 = arith.constant 0 : i32
    return %arg0, %c0_i32, %c0_i32_0 : i32, i32, i32
  }
  func.func @transform_10(%arg0: i32) -> (i32, i32, i32) {
    %c0_i32 = arith.constant 0 : i32
    %c0_i32_0 = arith.constant 0 : i32
    %c0_i32_1 = arith.constant 0 : i32
    return %arg0, %c0_i32, %c0_i32_0 : i32, i32, i32
  }
}

</mosaic_0001>

<bundles_post_ra>
// kernel: expansion_layer_forward.5
= control target key start
LH: loop header
LB: loop body
LE: loop exit
PB: predicated region body
PF: predicated region fallthrough
CT: control target
= control target key end

     0   :  { %s287_s12 = smov 0   ;;  %s310_s0 = inlined_call_operand.vmem [shape: bf16[2,8,72], index: 0, kind: input, shape index: {}, may-alias: {0,3}]   ;;  %s311_s1 = inlined_call_operand.vmem [shape: f32[8,1], index: 1, kind: input, shape index: {}]   ;;  %s312_s2 = inlined_call_operand.vmem [shape: f32[8,1], index: 2, kind: input, shape index: {}]   ;;  %s313_s3 = inlined_call_operand.vmem [shape: bf16[2,8,72], index: 3, kind: output, shape index: {}, may-alias: {0,3}]  }
   0x1 LB: > { %s239_s13 = sadd.s32 4294967295, %s264_s12   ;;  %p243_p0 = scmp.ge.s32.totalorder %s264_s12, 1  ;;  %s264_s12 = sphi %s287_s12, %s13_s12  }
   0x2   : > { %p136_p1 = scmp.lt.s32.totalorder %s264_s12, 3 }
   0x4   : > { %p137_p2 = pnand %p243_p0, %p136_p1 }
   0x5   : > { %p158_p3 = scmp.lt.s32.totalorder (!%p137_p2), %s239_s13, 1 }
   0x6   : > { %140 = sbr.rel (%p137_p2) target bundleno = 148 (0x94), region = 32 }
   0xb   : > { %v168_v0 = vld [vmem:[%s311_s1] sm:$0xff]  ;;  %v266_v1 = vmov 0   ;;  %s315_s13 = smov (!%p158_p3, %s239_s13), 1  ;;  %vm184_vm0 = vcmask 584704  }
   0xc   : > { %257 = vset.pattern.permute.xlu0 %v266_v1  ;;  %v175_v2 = vld [vmem:[%s312_s2] sm:$0xff]  ;;  %s244_s18 = sshll.u32 %s315_s13, 2 }
   0xd   : > { %171 = vperm.xlu0 %257, %v168_v0   ;;  %s161_s21 = scalar_lea.vmem %s310_s0, %s244_s18  ;;  %s165_s24 = scalar_lea.vmem %s313_s3, %s244_s18 }
   0xe   : > { %v166_v3 = vld [vmem:[%s161_s21] sm:$0xf] }
   0xf   : > { %v167_v4 = vunpack.c.l.bf16 %v166_v3 }
  0x11   : > { %178 = vperm.xlu0 %257, %v175_v2  }
  0x88   : > { %v172_v5 = vpop.permute.xlu0 %171 }
  0x89   : > { %v174_v6 = vmul.f32 %v172_v5, %v167_v4 }
  0x8c   : > { %v179_v7 = vpop.permute.xlu0 %178 }
  0x8d   : > { %v181_v8 = vadd.f32 %v179_v7, %v174_v6 }
  0x8f   : > { %v182_v9 = vmax.f32 %v181_v8, 0.0 }
  0x91   : > { %v183_v10 = vpack.c.bf16 %v182_v9, %v182_v9 }
  0x93   : > { %185 = vst.msk [vmem:[%s165_s24] sm:$0xf] %vm184_vm0, %v183_v10 }
  0x94 PF: > { %s13_s12 = sadd.s32 1, %s264_s12  }
  0x95   : > { %p10_p4 = scmp.ge.s32.totalorder %s13_s12, 4  }
  0x97   :  { %12 = sbr.rel (!%p10_p4) target bundleno = 1 (0x1), region = 62 }

// kernel: expansion_layer_forward.3
= control target key start
LH: loop header
LB: loop body
LE: loop exit
PB: predicated region body
PF: predicated region fallthrough
CT: control target
= control target key end

     0   :  { %s706_s21 = smov 0   ;;  %s751_s0 = inlined_call_operand.vmem [shape: f32[2,32,7], index: 0, kind: input, shape index: {}]   ;;  %s752_s1 = inlined_call_operand.vmem [shape: f32[7,72], index: 1, kind: input, shape index: {}]   ;;  %s753_s2 = inlined_call_operand.vmem [shape: bf16[8,32], index: 2, kind: input, shape index: {}]   ;;  %s754_s3 = inlined_call_operand.vmem [shape: f32[8,1], index: 3, kind: input, shape index: {}]   ;;  %s755_s4 = inlined_call_operand.vmem [shape: f32[1,72], index: 4, kind: input, shape index: {}]   ;;  %s756_s5 = inlined_call_operand.vmem [shape: bf16[2,8,72], index: 5, kind: output, shape index: {0}]   ;;  %s757_s6 = inlined_call_operand.vmem [shape: f32[2,8,2], index: 6, kind: output, shape index: {1}]  }
   0x1 LB: > { %s593_s22 = sadd.s32 4294967295, %s660_s21   ;;  %p597_p0 = scmp.ge.s32.totalorder %s660_s21, 1  ;;  %s660_s21 = sphi %s706_s21, %s17_s21  }
   0x2   : > { %p215_p1 = scmp.lt.s32.totalorder %s660_s21, 3 }
   0x4   : > { %p216_p2 = pnand %p597_p0, %p215_p1 }
   0x5   : > { %p248_p3 = scmp.lt.s32.totalorder (!%p216_p2), %s593_s22, 1  ;;  %s662_s29 = smov (!%p216_p2), 110  }
   0x6   : > { %219 = sbr.rel (%p216_p2) target bundleno = 698 (0x2ba), region = 40  ;;  %s663_s30 = smov (!%p216_p2), 92  }
   0x7   : > { %s664_s7 = smov (!%p216_p2), 74   ;;  %s665_s8 = smov (!%p216_p2), 18  }
   0x8   : > { %s667_s9 = smov (!%p216_p2), 36   ;;  %s669_s10 = smov (!%p216_p2), 54  }
   0xb   : > { %v266_v0 = vld [vmem:[%s752_s1] sm:$0x7f]  ;;  %vm280_vm0 = vcmask 1046528   ;;  %s759_s22 = smov (!%p248_p3, %s593_s22), 1  ;;  %vm267_vm1 = vcmask 56320   ;;  %vm369_vm2 = vcmask 146432  }
   0xc   : > { %620 = vmatprep.subr.msk.mxu0 %vm280_vm0, %v266_v0  ;;  %s611_s25 = sshll.u32 %s759_s22, 5  ;;  %v666_v8 = vmov 0.0   ;;  %vm668_vm3 = vmmov 0   ;;  %v670_v10 = vmov 0   ;;  %v436_v11 = vld [vmem:[%s754_s3] sm:$0xff]  ;;  %vm375_vm4 = vcmask 294032  }
   0xd   : > { %621 = vmatpush3.msk.msra.mxu0 %vm280_vm0, %v266_v0  ;;  %s252_s28 = scalar_lea.vmem %s751_s0, %s611_s25  ;;  %628 = vmatprep.subr.bf16.mxu1 %v666_v8  ;;  %vm381_vm5 = vcmask 441632   ;;  %vm387_vm6 = vcmask 589232   ;;  %v429_v30 = vld [vmem:[%s753_s2] sm:$0xf]  ;;  %vm442_vm7 = vcmask 261120   ;;  %s600_s17 = sshll.u32 %s759_s22, 2 }
   0xe   : > { %v262_v1 = vld [vmem:[%s252_s28] sm:$0xff]  ;;  %v263_v2 = vld [vmem:[%s252_s28 + $0x8] sm:$0xff]  ;;  %v264_v3 = vld [vmem:[%s252_s28 + $0x10] sm:$0xff]  ;;  %632 = vmatprep.mubr.msk.bf16.mxu1 %vm668_vm3, %v666_v8  ;;  %653 = vset.pattern.permute.xlu0 %v670_v10  ;;  %vm497_vm8 = vcmask 588800   ;;  %s256_s20 = scalar_lea.vmem %s756_s5, %s600_s17  ;;  %vm495_vm9 = vcmask 584704   ;;  %s601_s23 = sshll.u32 %s759_s22, 3 }
   0xf   : > { %622 = vmatprep.mubr.msk.f32.mxu0 %vm267_vm1, %v262_v1  ;;  %v265_v4 = vld [vmem:[%s252_s28 + $0x18] sm:$0xff]  ;;  %v608_v33 = vld [vmem:[%s755_s4] ss:$0 sm:$0xff]  ;;  %s260_s26 = scalar_lea.vmem %s757_s6, %s601_s23  ;;  %vm501_vm10 = vcmask 7168   ;;  %vm507_vm11 = vcmask 15368  }
  0x10   : > { %623 = vmatmul.mubr.msk.f32.vlgmr.msra.gmra.mxu0 %vm267_vm1, %v263_v2 }
  0x11   : > { %625 = vmatprep.mubr.msk.f32.mxu0 %vm267_vm1, %v264_v3 }
  0x14   : > { %626 = vmatmul.mubr.msk.f32.gmra.mxu0 %vm267_vm1, %v265_v4 }
  0xd0   : > { %v624_v5 = vpop.f32.mrf.mxu0 }
  0xd1   : > { %407 = vrot.lane.b32.xlu1 %v624_v5, %s662_s29 }
  0xd2   : > { %v350_v6 = vpop.f32.mrf.mxu0 }
  0xd3   : > { %403 = vrot.lane.b32.xlu0 %v350_v6, %s663_s30  ;;  %370 = vst.msk [vmem:[#allocation2] sm:$0xff] %vm369_vm2, %v350_v6 }
  0xd4   : > { %v627_v7 = vpop.f32.mrf.mxu0 }
  0xd5   : > { %420 = vrot.lane.b32.xlu1 %v624_v5, %s663_s30 }
  0xd6   : > { %v360_v9 = vpop.f32.mrf.mxu0 }
  0xd7   : > { %416 = vrot.lane.b32.xlu0 %v350_v6, %s664_s7 }
  0xd9   : > { %372 = vrot.lane.b32.xlu1 %v624_v5, %s665_s8 }
  0xdb   : > { %390 = vrot.lane.b32.xlu0 %v350_v6, %s662_s29 }
  0xdd   : > { %412 = vrot.lane.b32.xlu1 %v627_v7, %s665_s8 }
  0xdf   : > { %424 = vrot.lane.b32.xlu0 %v360_v9, %s662_s29 }
  0xe1   : > { %395 = vrot.lane.b32.xlu1 %v360_v9, %s665_s8 }
  0xe3   : > { %378 = vrot.lane.b32.xlu0 %v360_v9, %s667_s9 }
  0xe5   : > { %399 = vrot.lane.b32.xlu1 %v627_v7, %s667_s9 }
  0xe7   : > { %384 = vrot.lane.b32.xlu0 %v627_v7, %s669_s10 }
  0xeb   : > { %439 = vperm.xlu0 %653, %v436_v11  }
 0x143   : > { %v408_v12 = vpop.permute.xlu1 %407 }
 0x145   : > { %v404_v13 = vpop.permute.xlu0 %403 }
 0x146   : > { %406 = vst.msk [vmem:[#allocation2 + $0x10] sm:$0xff] %vm369_vm2, %v404_v13 }
 0x147   : > { %410 = vst.msk [vmem:[#allocation2 + $0x10] sm:$0xff] %vm375_vm4, %v408_v12  ;;  %v421_v14 = vpop.permute.xlu1 %420 }
 0x148   : > { %411 = vst.msk [vmem:[#allocation2 + $0x10] sm:$0xff] %vm381_vm5, %v360_v9 }
 0x149   : > { %v417_v15 = vpop.permute.xlu0 %416 }
 0x14a   : > { %419 = vst.msk [vmem:[#allocation2 + $0x18] sm:$0xff] %vm369_vm2, %v417_v15 }
 0x14b   : > { %423 = vst.msk [vmem:[#allocation2 + $0x18] sm:$0xff] %vm375_vm4, %v421_v14  ;;  %v373_v16 = vpop.permute.xlu1 %372 }
 0x14c   : > { %376 = vst.msk [vmem:[#allocation2] sm:$0xff] %vm375_vm4, %v373_v16 }
 0x14d   : > { %v391_v17 = vpop.permute.xlu0 %390 }
 0x14e   : > { %393 = vst.msk [vmem:[#allocation2 + $0x8] sm:$0xff] %vm369_vm2, %v391_v17 }
 0x14f   : > { %394 = vst.msk [vmem:[#allocation2 + $0x8] sm:$0xff] %vm375_vm4, %v624_v5  ;;  %v413_v18 = vpop.permute.xlu1 %412 }
 0x150   : > { %415 = vst.msk [vmem:[#allocation2 + $0x10] sm:$0xff] %vm387_vm6, %v413_v18 }
 0x151   : > { %v425_v19 = vpop.permute.xlu0 %424 }
 0x152   : > { %427 = vst.msk [vmem:[#allocation2 + $0x18] sm:$0xff] %vm381_vm5, %v425_v19 }
 0x153   : > { %428 = vst.msk [vmem:[#allocation2 + $0x18] sm:$0xff] %vm387_vm6, %v627_v7  ;;  %v396_v20 = vpop.permute.xlu1 %395 }
 0x154   : > { %398 = vst.msk [vmem:[#allocation2 + $0x8] sm:$0xff] %vm381_vm5, %v396_v20 }
 0x155   : > { %v379_v21 = vpop.permute.xlu0 %378 }
 0x156   : > { %382 = vst.msk [vmem:[#allocation2] sm:$0xff] %vm381_vm5, %v379_v21 }
 0x157   : > { %v400_v22 = vpop.permute.xlu1 %399  ;;  %v432_v24 = vld [vmem:[#allocation2 + $0x10] sm:$0xff] }
 0x158   : > { %402 = vst.msk [vmem:[#allocation2 + $0x8] sm:$0xff] %vm387_vm6, %v400_v22 }
 0x159   : > { %v385_v23 = vpop.permute.xlu0 %384 }
 0x15a   : > { %388 = vst.msk [vmem:[#allocation2] sm:$0xff] %vm387_vm6, %v385_v23  ;;  %v433_v25 = vld [vmem:[#allocation2 + $0x18] sm:$0xff] }
 0x15b   : > { %v435_v26 = vpack.c.bf16 %v433_v25, %v432_v24 }
 0x15d   : > { %629 = vmatpush3.bf16.msra.mxu1 %v435_v26 }
 0x15e   : > { %630 = vmatprep.subr.bf16.mxu1 %v666_v8 }
 0x15f   : > { %v431_v28 = vld [vmem:[#allocation2 + $0x8] sm:$0xff] }
 0x161   : > { %v430_v27 = vld [vmem:[#allocation2] sm:$0xff] }
 0x162   : > { %v434_v29 = vpack.c.bf16 %v431_v28, %v430_v27 }
 0x164   : > { %631 = vmatpush3.bf16.msra.mxu1 %v434_v29 }
 0x166   : > { %v440_v31 = vpop.permute.xlu0 %439 }
 0x167   : > { %633 = vmatmul.mubr.msk.bf16.vlgmr.msra.gmra.mxu1 %vm442_vm7, %v429_v30 }
 0x227   : > { %v480_v32 = vpop.f32.mrf.mxu1 }
 0x228   : > { %v481_v34 = vadd.f32 %v480_v32, %v440_v31 }
 0x229   : > { %v634_v35 = vpop.f32.mrf.mxu1 }
 0x22a   : > { %v493_v36 = vmul.f32 %v608_v33, %v481_v34 }
 0x22b   : > { %v483_v37 = vpop.f32.mrf.mxu1 }
 0x22c   : > { %v494_v38 = vpack.c.bf16 %v493_v36, %v493_v36  ;;  %v498_v39 = vsel %vm497_vm8, %v493_v36, 0.0  ;;  %v503_v40 = vmul.f32 %v493_v36, %v493_v36 }
 0x22d   : > { %499 = vadd.xlane.f32.xlu1 %v498_v39  ;;  %v635_v41 = vpop.f32.mrf.mxu1 }
 0x22e   : > { %496 = vst.msk [vmem:[%s256_s20] sm:$0xf] %vm495_vm9, %v494_v38  ;;  %v504_v42 = vsel %vm497_vm8, %v503_v40, 0.0 }
 0x22f   : > { %505 = vadd.xlane.f32.xlu0 %v504_v42 }
 0x2b6   : > { %v500_v43 = vpop.xlane.xlu1 %499 }
 0x2b7   : > { %502 = vst.msk [vmem:[%s260_s26] sm:$0xff] %vm501_vm10, %v500_v43 }
 0x2b8   : > { %v506_v44 = vpop.xlane.xlu0 %505 }
 0x2b9   : > { %508 = vst.msk [vmem:[%s260_s26] sm:$0xff] %vm507_vm11, %v506_v44 }
 0x2ba PF: > { %s17_s21 = sadd.s32 1, %s660_s21  }
 0x2bb   : > { %p14_p4 = scmp.ge.s32.totalorder %s17_s21, 4  }
 0x2bd   :  { %16 = sbr.rel (!%p14_p4) target bundleno = 1 (0x1), region = 82 }

// kernel: expansion_layer_forward.4
= control target key start
LH: loop header
LB: loop body
LE: loop exit
PB: predicated region body
PF: predicated region fallthrough
CT: control target
= control target key end

     0   :  { %s833_s13 = smov 0   ;;  %s931_s0 = inlined_call_operand.vmem [shape: bf16[2,8,72], index: 0, kind: input, shape index: {}]   ;;  %s932_s1 = inlined_call_operand.vmem [shape: bf16[2,8,72], index: 1, kind: input, shape index: {}]   ;;  %s933_s2 = inlined_call_operand.vmem [shape: f32[1,72], index: 2, kind: input, shape index: {}]   ;;  %s934_s3 = inlined_call_operand.vmem [shape: f32[8,1], index: 3, kind: input, shape index: {}]   ;;  %s935_s4 = inlined_call_operand.vmem [shape: f32[8,1], index: 4, kind: input, shape index: {}]   ;;  %s936_s5 = inlined_call_operand.vmem [shape: bf16[8,48], index: 5, kind: input, shape index: {}]   ;;  %s937_s6 = inlined_call_operand.vmem [shape: f32[8,1], index: 6, kind: input, shape index: {}]   ;;  %s938_s7 = inlined_call_operand.vmem [shape: bf16[8,24], index: 7, kind: input, shape index: {}]   ;;  %s939_s8 = inlined_call_operand.vmem [shape: f32[8,1], index: 8, kind: input, shape index: {}]   ;;  %s940_s9 = inlined_call_operand.vmem [shape: bf16[2,8,72], index: 9, kind: output, shape index: {0}]   ;;  %s941_s10 = inlined_call_operand.vmem [shape: f32[2,8,2], index: 10, kind: output, shape index: {1}]  }
   0x1 LB: > { %s710_s14 = sadd.s32 4294967295, %s770_s13   ;;  %p714_p0 = scmp.ge.s32.totalorder %s770_s13, 1  ;;  %s770_s13 = sphi %s833_s13, %s21_s13  }
   0x2   : > { %p323_p1 = scmp.lt.s32.totalorder %s770_s13, 3 }
   0x4   : > { %p324_p2 = pnand %p714_p0, %p323_p1 }
   0x5   : > { %p367_p3 = scmp.lt.s32.totalorder (!%p324_p2), %s710_s14, 1  ;;  %s774_s28 = smov (!%p324_p2), 1  }
   0x6   : > { %327 = sbr.rel (%p324_p2) target bundleno = 1204 (0x4b4), region = 56  ;;  %s775_s29 = smov (!%p324_p2), 126  }
   0x7   : > { %s776_s30 = smov (!%p324_p2), 127  }
   0xb   : > { %v387_v0 = vld [vmem:[%s934_s3] sm:$0xff]  ;;  %v772_v1 = vmov 0   ;;  %vm409_vm0 = vcmask 7168   ;;  %vm412_vm1 = vcmask 605768   ;;  %v773_v3 = vmov 0.0   ;;  %s943_s14 = smov (!%p367_p3, %s710_s14), 1 }
   0xc   : > { %763 = vset.pattern.permute.xlu0 %v772_v1  ;;  %v394_v2 = vld [vmem:[%s935_s4] sm:$0xff]  ;;  %410 = vst.msk [vmem:[#allocation2] sm:$0xff] %vm409_vm0, %v773_v3  ;;  %411 = vst.msk [vmem:[#allocation2 + $0x8] sm:$0xff] %vm409_vm0, %v773_v3  ;;  %731 = vmatprep.subr.bf16.mxu0 %v773_v3  ;;  %s861_s19 = sshll.u32 %s943_s14, 2  ;;  %vm419_vm2 = vcmask 597000   ;;  %vm430_vm3 = vcmask 588800  }
   0xd   : > { %390 = vperm.xlu0 %763, %v387_v0   ;;  %519 = vst.msk [vmem:[#allocation4] sm:$0xff] %vm409_vm0, %v773_v3  ;;  %741 = vmatprep.subr.bf16.mxu1 %v773_v3  ;;  %s370_s22 = scalar_lea.vmem %s931_s0, %s861_s19  ;;  %s374_s25 = scalar_lea.vmem %s932_s1, %s861_s19  ;;  %v874_v10 = vld [vmem:[%s933_s2] ss:$0 sm:$0xff]  ;;  %vm777_vm4 = vmmov 0   ;;  %vm473_vm5 = vcmask 392192   ;;  %vm556_vm6 = vcmask 1043456  }
   0xe   : > { %413 = vst.msk [vmem:[#allocation2] sm:$0xff] %vm412_vm1, %v773_v3  ;;  %414 = vst.msk [vmem:[#allocation2 + $0x8] sm:$0xff] %vm412_vm1, %v773_v3  ;;  %v385_v4 = vld [vmem:[%s370_s22] sm:$0xf]  ;;  %737 = vmatprep.mubr.msk.bf16.mxu0 %vm777_vm4, %v773_v3  ;;  %745 = vmatprep.mubr.msk.bf16.mxu1 %vm777_vm4, %v773_v3  ;;  %vm552_vm7 = vcmask 195584   ;;  %s378_s24 = scalar_lea.vmem %s940_s9, %s861_s19  ;;  %vm602_vm8 = vcmask 584704  }
   0xf   : > { %520 = vst.msk [vmem:[#allocation4] sm:$0xff] %vm412_vm1, %v773_v3  ;;  %v386_v5 = vunpack.c.l.bf16 %v385_v4  ;;  %v421_v12 = vld [vmem:[%s374_s25] sm:$0xf]  ;;  %s718_s25 = sshll.u32 %s943_s14, 3  ;;  %vm612_vm9 = vcmask 15368  }
  0x10   : > { %v422_v14 = vunpack.c.l.bf16 %v421_v12  ;;  %v467_v19 = vld [vmem:[%s937_s6] sm:$0xff] }
  0x11   : > { %397 = vperm.xlu0 %763, %v394_v2   ;;  %v457_v33 = vld [vmem:[%s936_s5] sm:$0xf] }
  0x12   : > { %v546_v44 = vld [vmem:[%s939_s8] sm:$0xff] }
  0x13   : > { %v540_v53 = vld [vmem:[%s938_s7] sm:$0xf] }
  0x88   : > { %v391_v6 = vpop.permute.xlu0 %390 }
  0x89   : > { %v393_v7 = vmul.f32 %v391_v6, %v386_v5 }
  0x8c   : > { %v398_v8 = vpop.permute.xlu0 %397 }
  0x8d   : > { %v400_v9 = vadd.f32 %v398_v8, %v393_v7 }
  0x8f   : > { %v401_v11 = vmax.f32 %v400_v9, 0.0 }
  0x91   : > { %v408_v13 = vmul.f32 %v874_v10, %v401_v11 }
  0x93   : > { %416 = vrot.lane.b32.xlu1 %v408_v13, %s774_s28 }
  0x97   : > { %424 = vrot.lane.b32.xlu1 %v422_v14, %s774_s28 }
 0x105   : > { %v417_v15 = vpop.permute.xlu1 %416 }
 0x106   : > { %420 = vst.msk [vmem:[#allocation2] sm:$0xff] %vm419_vm2, %v417_v15 }
 0x109   : > { %v425_v16 = vpop.permute.xlu1 %424 }
 0x10a   : > { %427 = vst.msk [vmem:[#allocation2 + $0x8] sm:$0xff] %vm419_vm2, %v425_v16 }
 0x10d   : > { %v428_v17 = vld [vmem:[#allocation2] sm:$0xff] }
 0x10e   : > { %449 = vrot.lane.b32.xlu0 %v428_v17, %s775_s29  ;;  %431 = vst.msk [vmem:[#allocation3] sm:$0xff] %vm430_vm3, %v428_v17 }
 0x111   : > { %v429_v18 = vld [vmem:[#allocation2 + $0x8] sm:$0xff] }
 0x112   : > { %437 = vrot.lane.b32.xlu0 %v428_v17, %s776_s30  ;;  %451 = vrot.lane.b32.xlu1 %v429_v18, %s775_s29  ;;  %432 = vst.msk [vmem:[#allocation3 + $0x8] sm:$0xff] %vm430_vm3, %v429_v18 }
 0x115   : > { %v458_v31 = vld [vmem:[#allocation3] sm:$0xff] }
 0x116   : > { %470 = vperm.xlu0 %763, %v467_v19   ;;  %439 = vrot.lane.b32.xlu1 %v429_v18, %s776_s30 }
 0x119   : > { %v459_v30 = vld [vmem:[#allocation3 + $0x8] sm:$0xff] }
 0x11a   : > { %v464_v32 = vpack.c.bf16 %v459_v30, %v458_v31 }
 0x180   : > { %v450_v20 = vpop.permute.xlu0 %449 }
 0x181   : > { %455 = vst.msk [vmem:[#allocation3 + $0x20] sm:$0xff] %vm430_vm3, %v450_v20 }
 0x184   : > { %v438_v21 = vpop.permute.xlu0 %437  ;;  %v452_v22 = vpop.permute.xlu1 %451 }
 0x185   : > { %443 = vst.msk [vmem:[#allocation3 + $0x10] sm:$0xff] %vm430_vm3, %v438_v21  ;;  %456 = vst.msk [vmem:[#allocation3 + $0x28] sm:$0xff] %vm430_vm3, %v452_v22 }
 0x188   : > { %v440_v23 = vpop.permute.xlu1 %439  ;;  %v462_v24 = vld [vmem:[#allocation3 + $0x20] sm:$0xff] }
 0x189   : > { %444 = vst.msk [vmem:[#allocation3 + $0x18] sm:$0xff] %vm430_vm3, %v440_v23 }
 0x18c   : > { %v463_v25 = vld [vmem:[#allocation3 + $0x28] sm:$0xff]  ;;  %v460_v27 = vld [vmem:[#allocation3 + $0x10] sm:$0xff] }
 0x18d   : > { %v466_v26 = vpack.c.bf16 %v463_v25, %v462_v24 }
 0x18f   : > { %732 = vmatpush3.bf16.msra.mxu0 %v466_v26 }
 0x190   : > { %733 = vmatprep.subr.bf16.mxu0 %v773_v3  ;;  %v461_v28 = vld [vmem:[#allocation3 + $0x18] sm:$0xff] }
 0x191   : > { %v465_v29 = vpack.c.bf16 %v461_v28, %v460_v27  ;;  %v471_v34 = vpop.permute.xlu0 %470 }
 0x193   : > { %734 = vmatpush3.bf16.msra.mxu0 %v465_v29 }
 0x194   : > { %735 = vmatprep.subr.bf16.mxu0 %v773_v3 }
 0x197   : > { %736 = vmatpush3.bf16.msra.mxu0 %v464_v32 }
 0x19a   : > { %738 = vmatmul.mubr.msk.bf16.vlgmr.msra.gmra.mxu0 %vm473_vm5, %v457_v33 }
 0x25a   : > { %v511_v35 = vpop.f32.mrf.mxu0 }
 0x25b   : > { %v512_v36 = vadd.f32 %v511_v35, %v471_v34 }
 0x25c   : > { %v739_v37 = vpop.f32.mrf.mxu0 }
 0x25d   : > { %v517_v38 = vmax.f32 %v512_v36, 0.0 }
 0x25e   : > { %v514_v39 = vpop.f32.mrf.mxu0 }
 0x25f   : > { %v518_v40 = vmul.f32 %v874_v10, %v517_v38 }
 0x260   : > { %v740_v41 = vpop.f32.mrf.mxu0 }
 0x261   : > { %522 = vrot.lane.b32.xlu1 %v518_v40, %s774_s28  ;;  %s382_s28 = scalar_lea.vmem %s941_s10, %s718_s25 }
 0x2d3   : > { %v523_v42 = vpop.permute.xlu1 %522 }
 0x2d4   : > { %525 = vst.msk [vmem:[#allocation4] sm:$0xff] %vm419_vm2, %v523_v42 }
 0x2db   : > { %v526_v43 = vld [vmem:[#allocation4] sm:$0xff] }
 0x2dc   : > { %527 = vst.msk [vmem:[#allocation5] sm:$0xff] %vm430_vm3, %v526_v43  ;;  %536 = vrot.lane.b32.xlu0 %v526_v43, %s775_s29  ;;  %530 = vrot.lane.b32.xlu1 %v526_v43, %s776_s30 }
 0x2e0   : > { %549 = vperm.xlu0 %763, %v546_v44  }
 0x2e3   : > { %v541_v51 = vld [vmem:[#allocation5] sm:$0xff] }
 0x34e   : > { %v537_v45 = vpop.permute.xlu0 %536  ;;  %v531_v46 = vpop.permute.xlu1 %530 }
 0x34f   : > { %539 = vst.msk [vmem:[#allocation5 + $0x10] sm:$0xff] %vm430_vm3, %v537_v45  ;;  %533 = vst.msk [vmem:[#allocation5 + $0x8] sm:$0xff] %vm430_vm3, %v531_v46 }
 0x356   : > { %v543_v47 = vld [vmem:[#allocation5 + $0x10] sm:$0xff]  ;;  %v542_v50 = vld [vmem:[#allocation5 + $0x8] sm:$0xff] }
 0x357   : > { %v545_v48 = vpack.c.bf16 %v543_v47, %v543_v47  ;;  %v544_v52 = vpack.c.bf16 %v542_v50, %v541_v51 }
 0x359   : > { %v558_v49 = vsel %vm556_vm6, %v545_v48, 0 }
 0x35a   : > { %742 = vmatpush3.bf16.msra.mxu1 %v558_v49 }
 0x35b   : > { %743 = vmatprep.subr.bf16.mxu1 %v773_v3  ;;  %v550_v54 = vpop.permute.xlu0 %549 }
 0x35e   : > { %744 = vmatpush3.bf16.msra.mxu1 %v544_v52 }
 0x361   : > { %746 = vmatmul.mubr.msk.bf16.vlgmr.msra.gmra.mxu1 %vm552_vm7, %v540_v53 }
 0x421   : > { %v594_v55 = vpop.f32.mrf.mxu1 }
 0x422   : > { %v595_v56 = vadd.f32 %v594_v55, %v550_v54 }
 0x423   : > { %v747_v57 = vpop.f32.mrf.mxu1 }
 0x424   : > { %v600_v58 = vmul.f32 %v874_v10, %v595_v56 }
 0x425   : > { %v597_v59 = vpop.f32.mrf.mxu1 }
 0x426   : > { %v601_v60 = vpack.c.bf16 %v600_v58, %v600_v58  ;;  %v604_v61 = vsel %vm430_vm3, %v600_v58, 0.0  ;;  %v608_v62 = vmul.f32 %v600_v58, %v600_v58 }
 0x427   : > { %605 = vadd.xlane.f32.xlu1 %v604_v61  ;;  %v748_v63 = vpop.f32.mrf.mxu1 }
 0x428   : > { %603 = vst.msk [vmem:[%s378_s24] sm:$0xf] %vm602_vm8, %v601_v60  ;;  %v609_v0 = vsel %vm430_vm3, %v608_v62, 0.0 }
 0x429   : > { %610 = vadd.xlane.f32.xlu0 %v609_v0 }
 0x4b0   : > { %v606_v1 = vpop.xlane.xlu1 %605 }
 0x4b1   : > { %607 = vst.msk [vmem:[%s382_s28] sm:$0xff] %vm409_vm0, %v606_v1 }
 0x4b2   : > { %v611_v2 = vpop.xlane.xlu0 %610 }
 0x4b3   : > { %613 = vst.msk [vmem:[%s382_s28] sm:$0xff] %vm612_vm9, %v611_v2 }
 0x4b4 PF: > { %s21_s13 = sadd.s32 1, %s770_s13  }
 0x4b5   : > { %p18_p4 = scmp.ge.s32.totalorder %s21_s13, 4  }
 0x4b7   :  { %20 = sbr.rel (!%p18_p4) target bundleno = 1 (0x1), region = 101 }

</bundles_post_ra>
